<compile_context>
chip_gen: v7x
topology: tpu7x:2x2x1
jax: 0.10.0
libtpu: 0.0.40
codegen_flags: <defaults>
</compile_context>

<pallas_src>
import math

import jax
import jax.numpy as jnp
from jax.experimental import pallas as pl
from jax.experimental.pallas import tpu as pltpu


def _gcn_kernel(x_ref, adj_ref, w1_ref, b1_ref, w2_ref, b2_ref,
                wlin_ref, blin_ref, out_ref):
    """One graph per grid step: gc1 -> relu -> gc2 -> relu -> gc2 -> relu -> lin -> log_softmax."""
    f32 = jnp.float32
    bf16 = jnp.bfloat16

    adj = adj_ref[...]                 # (N, N) bf16
    x = x_ref[...]                     # (N, F) bf16
    nfeat = x_ref.shape[1]
    hidden = w2_ref.shape[0]

    # --- GraphConvolution 1: relu(adj @ (x @ W1) + b1) ---
    # Re-associate to (adj @ x) @ W1 when F < H: the N^2 matmul then runs over F
    # columns instead of H (identical result up to fp rounding).
    if nfeat < hidden:
        ax = jnp.dot(adj, x, preferred_element_type=f32).astype(bf16)
        y1 = jnp.dot(ax, w1_ref[...], preferred_element_type=f32)
    else:
        s1 = jnp.dot(x, w1_ref[...], preferred_element_type=f32).astype(bf16)
        y1 = jnp.dot(adj, s1, preferred_element_type=f32)
    x1 = jnp.maximum(y1 + b1_ref[...], 0.0)          # f32 elementwise
    x1_b = x1.astype(bf16)

    # --- GraphConvolution 2: relu(adj @ (x1 @ W2) + b2) ---
    s2 = jnp.dot(x1_b, w2_ref[...], preferred_element_type=f32).astype(bf16)
    x2 = jnp.maximum(jnp.dot(adj, s2, preferred_element_type=f32) + b2_ref[...], 0.0)
    x2_b = x2.astype(bf16)

    # --- Layer 3: the PyTorch forward calls self.gc2 again (gc3 unused here) ---
    s3 = jnp.dot(x2_b, w2_ref[...], preferred_element_type=f32).astype(bf16)
    x3 = jnp.maximum(jnp.dot(adj, s3, preferred_element_type=f32) + b2_ref[...], 0.0)
    x3_b = x3.astype(bf16)

    # --- Linear over cat([x1, x2, x3], dim=1): split Wlin (static ref views, no concat) ---
    h = hidden
    logits = (jnp.dot(x1_b, wlin_ref[0:h, :], preferred_element_type=f32)
              + jnp.dot(x2_b, wlin_ref[h:2 * h, :], preferred_element_type=f32)
              + jnp.dot(x3_b, wlin_ref[2 * h:3 * h, :], preferred_element_type=f32)
              + blin_ref[...])

    # --- log_softmax along the class axis (f32) ---
    m = jnp.max(logits, axis=1, keepdims=True)
    shifted = logits - m
    lse = jnp.log(jnp.sum(jnp.exp(shifted), axis=1, keepdims=True))
    out_ref[...] = shifted - lse


def gcn_synthetic_forward(x, adj, params):
    """Full GCNSynthetic forward for a batch of graphs in a single Pallas call.

    x:   (B, N, F) or (N, F) float32
    adj: (B, N, N) or (N, N) float32 (normalized dense adjacency)
    params: dict with w1 (F,H), b1 (H,), w2 (H,H), b2 (H,), wlin (3H, C), blin (C,)
    """
    squeeze = (x.ndim == 2)
    if squeeze:
        x = x[None]
        adj = adj[None]

    B, N, F = x.shape
    H = params["w2"].shape[0]
    C = params["blin"].shape[0]

    # bf16 matmul operands, f32 biases (elementwise math stays f32 in-kernel).
    x_b = x.astype(jnp.bfloat16)
    adj_b = adj.astype(jnp.bfloat16)
    w1 = params["w1"].astype(jnp.bfloat16)
    w2 = params["w2"].astype(jnp.bfloat16)
    wlin = params["wlin"].astype(jnp.bfloat16)
    b1 = params["b1"].reshape(1, -1).astype(jnp.float32)
    b2 = params["b2"].reshape(1, -1).astype(jnp.float32)
    blin = params["blin"].reshape(1, -1).astype(jnp.float32)

    # Explicit scoped-VMEM budget: double-buffered per-graph tiles + weights + headroom.
    per_graph_bytes = 2 * N * N + 2 * N * F + 4 * N * C          # bf16 adj/x, f32 out
    weight_bytes = 2 * (F * H + H * H + 3 * H * C) + 4 * (2 * H + C)
    est = 4 * per_graph_bytes + 2 * weight_bytes + (8 << 20)
    vmem_limit = int(min(64 << 20, max(16 << 20, est)))          # stay under v7x physical

    out = pl.pallas_call(
        _gcn_kernel,
        out_shape=jax.ShapeDtypeStruct((B, N, C), jnp.float32),
        grid=(B,),
        in_specs=[
            pl.BlockSpec((None, N, F), lambda b: (b, 0, 0)),      # x: one graph per step
            pl.BlockSpec((None, N, N), lambda b: (b, 0, 0)),      # adj: one graph per step
            pl.BlockSpec((F, H), lambda b: (0, 0)),               # weights pinned: no re-DMA
            pl.BlockSpec((1, H), lambda b: (0, 0)),
            pl.BlockSpec((H, H), lambda b: (0, 0)),
            pl.BlockSpec((1, H), lambda b: (0, 0)),
            pl.BlockSpec((3 * H, C), lambda b: (0, 0)),
            pl.BlockSpec((1, C), lambda b: (0, 0)),
        ],
        out_specs=pl.BlockSpec((None, N, C), lambda b: (b, 0, 0)),
        compiler_params=pltpu.CompilerParams(
            dimension_semantics=("parallel",),                    # shard graphs across TCs
            vmem_limit_bytes=vmem_limit,
        ),
    )(x_b, adj_b, w1, b1, w2, b2, wlin, blin)

    if squeeze:
        out = out[0]
    return out


def init_params(key, nfeat, hidden, nclass):
    """Deterministic init matching the PyTorch module's shapes & uniform ranges."""
    k1, k2, k3, k4, k5, k6 = jax.random.split(key, 6)
    stdv_g = 1.0 / math.sqrt(hidden)          # GraphConvolution: 1/sqrt(out_features)
    stdv_l = 1.0 / math.sqrt(3 * hidden)      # nn.Linear: 1/sqrt(in_features)
    return {
        "w1": jax.random.uniform(k1, (nfeat, hidden), jnp.float32, -stdv_g, stdv_g),
        "b1": jax.random.uniform(k2, (hidden,), jnp.float32, -stdv_g, stdv_g),
        "w2": jax.random.uniform(k3, (hidden, hidden), jnp.float32, -stdv_g, stdv_g),
        "b2": jax.random.uniform(k4, (hidden,), jnp.float32, -stdv_g, stdv_g),
        # nn.Linear weight is (nclass, 3*hidden) in torch; stored transposed here.
        "wlin": jax.random.uniform(k5, (3 * hidden, nclass), jnp.float32, -stdv_l, stdv_l),
        "blin": jax.random.uniform(k6, (nclass,), jnp.float32, -stdv_l, stdv_l),
    }


def _reference_forward(x, adj, params):
    """Pure-JAX f32 reference matching the PyTorch forward."""
    x1 = jax.nn.relu(adj @ (x @ params["w1"]) + params["b1"])
    x2 = jax.nn.relu(adj @ (x1 @ params["w2"]) + params["b2"])
    x3 = jax.nn.relu(adj @ (x2 @ params["w2"]) + params["b2"])
    logits = jnp.concatenate([x1, x2, x3], axis=-1) @ params["wlin"] + params["blin"]
    return jax.nn.log_softmax(logits, axis=-1)


if __name__ == "__main__":
    B, N, NFEAT, HIDDEN, NCLASS = 8, 64, 16, 32, 4

    key = jax.random.PRNGKey(0)
    kx, ka, kp = jax.random.split(key, 3)

    x = jax.random.normal(kx, (B, N, NFEAT), jnp.float32)

    # Per-graph symmetrically-normalized dense adjacency with self loops.
    a = (jax.random.uniform(ka, (B, N, N)) < 0.1).astype(jnp.float32)
    a = jnp.maximum(a, jnp.swapaxes(a, -1, -2)) + jnp.eye(N, dtype=jnp.float32)[None]
    deg = jnp.sum(a, axis=-1)
    d_inv_sqrt = 1.0 / jnp.sqrt(deg)
    adj = a * d_inv_sqrt[..., :, None] * d_inv_sqrt[..., None, :]

    params = init_params(kp, NFEAT, HIDDEN, NCLASS)

    out = gcn_synthetic_forward(x, adj, params)
    out = jax.block_until_ready(out)

    # Sanity: shape, log_softmax rows sum to ~1 after exp, and agreement with the
    # pure-f32 reference (tolerance covers bf16 matmul operands).
    assert out.shape == (B, N, NCLASS)
    row_sums = jnp.exp(out).sum(axis=-1)
    assert bool(jnp.all(jnp.abs(row_sums - 1.0) < 1e-3))
    ref = jax.vmap(lambda xx, aa: _reference_forward(xx, aa, params))(x, adj)
    assert bool(jnp.max(jnp.abs(out - ref)) < 5e-2)

    print("KERNEL_OK")
</pallas_src>

<mosaic_0001>
module attributes {stable_mosaic.version = 11 : i64} {
  func.func @_gcn_kernel(%arg0: i32, %arg1: memref<1x64x16xbf16, #tpu.memory_space<vmem>>, %arg2: memref<1x64x64xbf16, #tpu.memory_space<vmem>>, %arg3: memref<16x32xbf16, #tpu.memory_space<vmem>>, %arg4: memref<1x32xf32, #tpu.memory_space<vmem>>, %arg5: memref<32x32xbf16, #tpu.memory_space<vmem>>, %arg6: memref<1x32xf32, #tpu.memory_space<vmem>>, %arg7: memref<96x4xbf16, #tpu.memory_space<vmem>>, %arg8: memref<1x4xf32, #tpu.memory_space<vmem>>, %arg9: memref<1x64x4xf32, #tpu.memory_space<vmem>>) attributes {dimension_semantics = [#tpu.dimension_semantics<parallel>], iteration_bounds = array<i64: 8>, scalar_prefetch = 0 : i64, scratch_operands = 0 : i64, tpu.core_type = #tpu.core_type<tc>, window_params = [{transform_indices = @transform_0, window_bounds = array<i64: 1, 64, 16>}, {transform_indices = @transform_1, window_bounds = array<i64: 1, 64, 64>}, {pipeline_mode = #tpu.pipeline_mode<synchronous>, transform_indices = @transform_2, window_bounds = array<i64: 16, 32>}, {pipeline_mode = #tpu.pipeline_mode<synchronous>, transform_indices = @transform_3, window_bounds = array<i64: 1, 32>}, {pipeline_mode = #tpu.pipeline_mode<synchronous>, transform_indices = @transform_4, window_bounds = array<i64: 32, 32>}, {pipeline_mode = #tpu.pipeline_mode<synchronous>, transform_indices = @transform_5, window_bounds = array<i64: 1, 32>}, {pipeline_mode = #tpu.pipeline_mode<synchronous>, transform_indices = @transform_6, window_bounds = array<i64: 96, 4>}, {pipeline_mode = #tpu.pipeline_mode<synchronous>, transform_indices = @transform_7, window_bounds = array<i64: 1, 4>}, {transform_indices = @transform_8, window_bounds = array<i64: 1, 64, 4>}]} {
    %c0 = arith.constant 0 : index
    %c0_0 = arith.constant 0 : index
    %c0_1 = arith.constant 0 : index
    %0 = vector.load %arg2[%c0, %c0_0, %c0_1] : memref<1x64x64xbf16, #tpu.memory_space<vmem>>, vector<1x64x64xbf16>
    %1 = vector.shape_cast %0 : vector<1x64x64xbf16> to vector<64x64xbf16>
    %c0_2 = arith.constant 0 : index
    %c0_3 = arith.constant 0 : index
    %c0_4 = arith.constant 0 : index
    %2 = vector.load %arg1[%c0_2, %c0_3, %c0_4] : memref<1x64x16xbf16, #tpu.memory_space<vmem>>, vector<1x64x16xbf16>
    %3 = vector.shape_cast %2 : vector<1x64x16xbf16> to vector<64x16xbf16>
    %cst = arith.constant dense<0.000000e+00> : vector<64x16xf32>
    %4 = tpu.matmul %1, %3, %cst {dimension_numbers = #tpu.dot_dimension_numbers<[1], [0], [0], [1], [0, 0, 1, 1], [], []>} : vector<64x64xbf16>, vector<64x16xbf16>, vector<64x16xf32> -> vector<64x16xf32>
    %5 = arith.truncf %4 : vector<64x16xf32> to vector<64x16xbf16>
    %c0_5 = arith.constant 0 : index
    %c0_6 = arith.constant 0 : index
    %6 = vector.load %arg3[%c0_5, %c0_6] : memref<16x32xbf16, #tpu.memory_space<vmem>>, vector<16x32xbf16>
    %cst_7 = arith.constant dense<0.000000e+00> : vector<64x32xf32>
    %7 = tpu.matmul %5, %6, %cst_7 {dimension_numbers = #tpu.dot_dimension_numbers<[1], [0], [0], [1], [0, 0, 1, 1], [], []>} : vector<64x16xbf16>, vector<16x32xbf16>, vector<64x32xf32> -> vector<64x32xf32>
    %c0_8 = arith.constant 0 : index
    %c0_9 = arith.constant 0 : index
    %8 = vector.load %arg4[%c0_8, %c0_9] : memref<1x32xf32, #tpu.memory_space<vmem>>, vector<1x32xf32>
    %9 = vector.broadcast %8 : vector<1x32xf32> to vector<64x32xf32>
    %10 = arith.addf %7, %9 : vector<64x32xf32>
    %cst_10 = arith.constant 0.000000e+00 : f32
    %11 = vector.broadcast %cst_10 : f32 to vector<64x32xf32>
    %12 = arith.maximumf %10, %11 : vector<64x32xf32>
    %13 = arith.truncf %12 : vector<64x32xf32> to vector<64x32xbf16>
    %c0_11 = arith.constant 0 : index
    %c0_12 = arith.constant 0 : index
    %14 = vector.load %arg5[%c0_11, %c0_12] : memref<32x32xbf16, #tpu.memory_space<vmem>>, vector<32x32xbf16>
    %cst_13 = arith.constant dense<0.000000e+00> : vector<64x32xf32>
    %15 = tpu.matmul %13, %14, %cst_13 {dimension_numbers = #tpu.dot_dimension_numbers<[1], [0], [0], [1], [0, 0, 1, 1], [], []>} : vector<64x32xbf16>, vector<32x32xbf16>, vector<64x32xf32> -> vector<64x32xf32>
    %16 = arith.truncf %15 : vector<64x32xf32> to vector<64x32xbf16>
    %cst_14 = arith.constant dense<0.000000e+00> : vector<64x32xf32>
    %17 = tpu.matmul %1, %16, %cst_14 {dimension_numbers = #tpu.dot_dimension_numbers<[1], [0], [0], [1], [0, 0, 1, 1], [], []>} : vector<64x64xbf16>, vector<64x32xbf16>, vector<64x32xf32> -> vector<64x32xf32>
    %c0_15 = arith.constant 0 : index
    %c0_16 = arith.constant 0 : index
    %18 = vector.load %arg6[%c0_15, %c0_16] : memref<1x32xf32, #tpu.memory_space<vmem>>, vector<1x32xf32>
    %19 = vector.broadcast %18 : vector<1x32xf32> to vector<64x32xf32>
    %20 = arith.addf %17, %19 : vector<64x32xf32>
    %cst_17 = arith.constant 0.000000e+00 : f32
    %21 = vector.broadcast %cst_17 : f32 to vector<64x32xf32>
    %22 = arith.maximumf %20, %21 : vector<64x32xf32>
    %23 = arith.truncf %22 : vector<64x32xf32> to vector<64x32xbf16>
    %c0_18 = arith.constant 0 : index
    %c0_19 = arith.constant 0 : index
    %24 = vector.load %arg5[%c0_18, %c0_19] : memref<32x32xbf16, #tpu.memory_space<vmem>>, vector<32x32xbf16>
    %cst_20 = arith.constant dense<0.000000e+00> : vector<64x32xf32>
    %25 = tpu.matmul %23, %24, %cst_20 {dimension_numbers = #tpu.dot_dimension_numbers<[1], [0], [0], [1], [0, 0, 1, 1], [], []>} : vector<64x32xbf16>, vector<32x32xbf16>, vector<64x32xf32> -> vector<64x32xf32>
    %26 = arith.truncf %25 : vector<64x32xf32> to vector<64x32xbf16>
    %cst_21 = arith.constant dense<0.000000e+00> : vector<64x32xf32>
    %27 = tpu.matmul %1, %26, %cst_21 {dimension_numbers = #tpu.dot_dimension_numbers<[1], [0], [0], [1], [0, 0, 1, 1], [], []>} : vector<64x64xbf16>, vector<64x32xbf16>, vector<64x32xf32> -> vector<64x32xf32>
    %c0_22 = arith.constant 0 : index
    %c0_23 = arith.constant 0 : index
    %28 = vector.load %arg6[%c0_22, %c0_23] : memref<1x32xf32, #tpu.memory_space<vmem>>, vector<1x32xf32>
    %29 = vector.broadcast %28 : vector<1x32xf32> to vector<64x32xf32>
    %30 = arith.addf %27, %29 : vector<64x32xf32>
    %cst_24 = arith.constant 0.000000e+00 : f32
    %31 = vector.broadcast %cst_24 : f32 to vector<64x32xf32>
    %32 = arith.maximumf %30, %31 : vector<64x32xf32>
    %33 = arith.truncf %32 : vector<64x32xf32> to vector<64x32xbf16>
    %c0_25 = arith.constant 0 : index
    %c0_26 = arith.constant 0 : index
    %34 = vector.load %arg7[%c0_25, %c0_26] : memref<96x4xbf16, #tpu.memory_space<vmem>>, vector<32x4xbf16>
    %cst_27 = arith.constant dense<0.000000e+00> : vector<64x4xf32>
    %35 = tpu.matmul %13, %34, %cst_27 {dimension_numbers = #tpu.dot_dimension_numbers<[1], [0], [0], [1], [0, 0, 1, 1], [], []>} : vector<64x32xbf16>, vector<32x4xbf16>, vector<64x4xf32> -> vector<64x4xf32>
    %c32 = arith.constant 32 : index
    %c0_28 = arith.constant 0 : index
    %36 = vector.load %arg7[%c32, %c0_28] : memref<96x4xbf16, #tpu.memory_space<vmem>>, vector<32x4xbf16>
    %cst_29 = arith.constant dense<0.000000e+00> : vector<64x4xf32>
    %37 = tpu.matmul %23, %36, %cst_29 {dimension_numbers = #tpu.dot_dimension_numbers<[1], [0], [0], [1], [0, 0, 1, 1], [], []>} : vector<64x32xbf16>, vector<32x4xbf16>, vector<64x4xf32> -> vector<64x4xf32>
    %38 = arith.addf %35, %37 : vector<64x4xf32>
    %c64 = arith.constant 64 : index
    %c0_30 = arith.constant 0 : index
    %39 = vector.load %arg7[%c64, %c0_30] : memref<96x4xbf16, #tpu.memory_space<vmem>>, vector<32x4xbf16>
    %cst_31 = arith.constant dense<0.000000e+00> : vector<64x4xf32>
    %40 = tpu.matmul %33, %39, %cst_31 {dimension_numbers = #tpu.dot_dimension_numbers<[1], [0], [0], [1], [0, 0, 1, 1], [], []>} : vector<64x32xbf16>, vector<32x4xbf16>, vector<64x4xf32> -> vector<64x4xf32>
    %41 = arith.addf %38, %40 : vector<64x4xf32>
    %c0_32 = arith.constant 0 : index
    %c0_33 = arith.constant 0 : index
    %42 = vector.load %arg8[%c0_32, %c0_33] : memref<1x4xf32, #tpu.memory_space<vmem>>, vector<1x4xf32>
    %43 = vector.broadcast %42 : vector<1x4xf32> to vector<64x4xf32>
    %44 = arith.addf %41, %43 : vector<64x4xf32>
    %cst_34 = arith.constant dense<0xFF800000> : vector<64xf32>
    %45 = vector.multi_reduction <maximumf>, %44, %cst_34 [1] : vector<64x4xf32> to vector<64xf32>
    %46 = vector.shape_cast %45 : vector<64xf32> to vector<64x1xf32>
    %47 = vector.broadcast %46 : vector<64x1xf32> to vector<64x4xf32>
    %48 = arith.subf %44, %47 : vector<64x4xf32>
    %49 = math.exp %48 : vector<64x4xf32>
    %cst_35 = arith.constant dense<0.000000e+00> : vector<64xf32>
    %50 = vector.multi_reduction <add>, %49, %cst_35 [1] : vector<64x4xf32> to vector<64xf32>
    %51 = vector.shape_cast %50 : vector<64xf32> to vector<64x1xf32>
    %52 = math.log %51 : vector<64x1xf32>
    %53 = vector.broadcast %52 : vector<64x1xf32> to vector<64x4xf32>
    %54 = arith.subf %48, %53 : vector<64x4xf32>
    %c0_36 = arith.constant 0 : index
    %c0_37 = arith.constant 0 : index
    %c0_38 = arith.constant 0 : index
    %55 = vector.load %arg9[%c0_36, %c0_37, %c0_38] : memref<1x64x4xf32, #tpu.memory_space<vmem>>, vector<1x64x4xf32>
    %56 = vector.shape_cast %55 : vector<1x64x4xf32> to vector<64x4xf32>
    %57 = vector.shape_cast %54 : vector<64x4xf32> to vector<1x64x4xf32>
    tpu.vector_store %arg9[%c0_36, %c0_37, %c0_38], %57 {strides = array<i32>} : memref<1x64x4xf32, #tpu.memory_space<vmem>>, vector<1x64x4xf32>,
    return
  }
  func.func @transform_0(%arg0: i32) -> (i32, i32, i32) {
    %c0_i32 = arith.constant 0 : i32
    %c0_i32_0 = arith.constant 0 : i32
    %c0_i32_1 = arith.constant 0 : i32
    return %arg0, %c0_i32, %c0_i32_0 : i32, i32, i32
  }
  func.func @transform_1(%arg0: i32) -> (i32, i32, i32) {
    %c0_i32 = arith.constant 0 : i32
    %c0_i32_0 = arith.constant 0 : i32
    %c0_i32_1 = arith.constant 0 : i32
    return %arg0, %c0_i32, %c0_i32_0 : i32, i32, i32
  }
  func.func @transform_2(%arg0: i32) -> (i32, i32) {
    %c0_i32 = arith.constant 0 : i32
    %c0_i32_0 = arith.constant 0 : i32
    %c0_i32_1 = arith.constant 0 : i32
    return %c0_i32, %c0_i32_0 : i32, i32
  }
  func.func @transform_3(%arg0: i32) -> (i32, i32) {
    %c0_i32 = arith.constant 0 : i32
    %c0_i32_0 = arith.constant 0 : i32
    %c0_i32_1 = arith.constant 0 : i32
    return %c0_i32, %c0_i32_0 : i32, i32
  }
  func.func @transform_4(%arg0: i32) -> (i32, i32) {
    %c0_i32 = arith.constant 0 : i32
    %c0_i32_0 = arith.constant 0 : i32
    %c0_i32_1 = arith.constant 0 : i32
    return %c0_i32, %c0_i32_0 : i32, i32
  }
  func.func @transform_5(%arg0: i32) -> (i32, i32) {
    %c0_i32 = arith.constant 0 : i32
    %c0_i32_0 = arith.constant 0 : i32
    %c0_i32_1 = arith.constant 0 : i32
    return %c0_i32, %c0_i32_0 : i32, i32
  }
  func.func @transform_6(%arg0: i32) -> (i32, i32) {
    %c0_i32 = arith.constant 0 : i32
    %c0_i32_0 = arith.constant 0 : i32
    %c0_i32_1 = arith.constant 0 : i32
    return %c0_i32, %c0_i32_0 : i32, i32
  }
  func.func @transform_7(%arg0: i32) -> (i32, i32) {
    %c0_i32 = arith.constant 0 : i32
    %c0_i32_0 = arith.constant 0 : i32
    %c0_i32_1 = arith.constant 0 : i32
    return %c0_i32, %c0_i32_0 : i32, i32
  }
  func.func @transform_8(%arg0: i32) -> (i32, i32, i32) {
    %c0_i32 = arith.constant 0 : i32
    %c0_i32_0 = arith.constant 0 : i32
    %c0_i32_1 = arith.constant 0 : i32
    return %arg0, %c0_i32, %c0_i32_0 : i32, i32, i32
  }
}

</mosaic_0001>

<bundles_post_ra>
// kernel: tpu_custom_call.1
= control target key start
LH: loop header
LB: loop body
LE: loop exit
PB: predicated region body
PF: predicated region fallthrough
CT: control target
= control target key end

     0   :  { %s1739_s27 = smov 0   ;;  %s1951_s0 = inlined_call_operand.vmem [shape: bf16[8,64,16], index: 0, kind: input, shape index: {}]   ;;  %s1952_s1 = inlined_call_operand.vmem [shape: bf16[8,64,64], index: 1, kind: input, shape index: {}]   ;;  %s1953_s2 = inlined_call_operand.vmem [shape: bf16[16,32], index: 2, kind: input, shape index: {}]   ;;  %s1954_s3 = inlined_call_operand.vmem [shape: f32[1,32], index: 3, kind: input, shape index: {}]   ;;  %s1955_s4 = inlined_call_operand.vmem [shape: bf16[32,32], index: 4, kind: input, shape index: {}]   ;;  %s1956_s5 = inlined_call_operand.vmem [shape: f32[1,32], index: 5, kind: input, shape index: {}]   ;;  %s1957_s6 = inlined_call_operand.vmem [shape: bf16[96,4], index: 6, kind: input, shape index: {}]   ;;  %s1958_s7 = inlined_call_operand.vmem [shape: f32[1,4], index: 7, kind: input, shape index: {}]   ;;  %s1959_s8 = inlined_call_operand.vmem [shape: f32[8,64,4], index: 8, kind: output, shape index: {}]  }
   0x1 LB: > { %s1364_s28 = sadd.s32 4294967295, %s1692_s27   ;;  %p1368_p0 = scmp.ge.s32.totalorder %s1692_s27, 1  ;;  %s1692_s27 = sphi %s1739_s27, %s18_s27  }
   0x2   : > { %p272_p1 = scmp.lt.s32.totalorder %s1692_s27, 9 }
   0x4   : > { %p273_p2 = pnand %p1368_p0, %p272_p1 }
   0x5   : > { %p311_p3 = scmp.lt.s32.totalorder (!%p273_p2), %s1364_s28, 7  ;;  %vm387_vm0 = vcmask (!%p273_p2), 523264   ;;  %v1645_v8 = vld [vmem:[%s1953_s2] sm:$0xff] (!%p273_p2)   ;;  %vm484_vm1 = vcmask (!%p273_p2), 130048   ;;  %v1647_v22 = vld [vmem:[%s1955_s4 + $0x8] sm:$0xff] (!%p273_p2)   ;;  %vm590_vm2 = vcmask (!%p273_p2), 261120  }
   0x6   : > { %276 = sbr.rel (%p273_p2) target bundleno = 1930 (0x78a), region = 52  ;;  %1511 = vmatprep.subr.bf16.mxu1 (!%p273_p2), %v1645_v8  ;;  %v1646_v9 = vld [vmem:[%s1955_s4] sm:$0xff] (!%p273_p2)   ;;  %vm1192_vm3 = vcmask (!%p273_p2), 31744  }
   0x7   : > { %1512 = vmatpush3.bf16.msra.mxu1 (!%p273_p2), %v1645_v8  ;;  %v1387_v23 = vld [vmem:[%s1954_s3] ss:$0 sm:$0xff] (!%p273_p2) }
   0x8   : > { %1549 = vmatprep.subr.bf16.mxu1 (!%p273_p2), %v1646_v9 }
   0xd   : > { %s1961_s28 = smov (!%p311_p3, %s1364_s28), 7 }
   0xe   : > { %s1433_s29 = sshll.u32 %s1961_s28, 5  ;;  %s1435_s18 = sshll.u32 %s1961_s28, 6 }
   0xf   : > { %s315_s10 = scalar_lea.vmem %s1951_s0, %s1433_s29  ;;  %s320_s13 = scalar_lea.vmem %s1952_s1, %s1433_s29 }
  0x10   : > { %v1637_v0 = vld [vmem:[%s315_s10] sm:$0xff]   ;;  %v1638_v1 = vld [vmem:[%s315_s10 + $0x8] sm:$0xff]   ;;  %v1639_v2 = vld [vmem:[%s315_s10 + $0x10] sm:$0xff]   ;;  %s1922_s21 = scalar_lea.vmem %s1959_s8, %s1435_s18 }
  0x11   : > { %1495 = vmatprep.subr.bf16.mxu0 %v1637_v0  ;;  %v1756_v3 = vld [vmem:[%s320_s13] sm:$0xff]   ;;  %v1640_v4 = vld [vmem:[%s315_s10 + $0x18] sm:$0xff]   ;;  %v1760_v5 = vld [vmem:[%s320_s13 + $0x8] sm:$0xff]  }
  0x12   : > { %1496 = vmatpush3.bf16.msra.mxu0 %v1637_v0  ;;  %1503 = vmatprep.mubr.msk.bf16.mxu0 %vm387_vm0, %v1756_v3  ;;  %v1762_v6 = vld [vmem:[%s320_s13 + $0x10] sm:$0xff]   ;;  %v1768_v7 = vld [vmem:[%s320_s13 + $0x18] sm:$0xff]  }
  0x13   : > { %1497 = vmatprep.subr.bf16.mxu0 %v1638_v1  ;;  %v1648_v0 = vld [vmem:[%s1957_s6 + $0x10] sm:$0xff]  }
  0x16   : > { %1498 = vmatpush3.bf16.msra.mxu0 %v1638_v1  ;;  %v1816_v1 = vld [vmem:[%s1956_s5] ss:$0 sm:$0xff] }
  0x17   : > { %1499 = vmatprep.subr.bf16.mxu0 %v1639_v2 }
  0x1a   : > { %1500 = vmatpush3.bf16.msra.mxu0 %v1639_v2 }
  0x1b   : > { %1501 = vmatprep.subr.bf16.mxu0 %v1640_v4 }
  0x1e   : > { %1502 = vmatpush3.bf16.msra.mxu0 %v1640_v4 }
  0x1f   : > { %1521 = vmatprep.subr.bf16.mxu0 %v1646_v9 }
  0x21   : > { %1504 = vmatmul.mubr.msk.bf16.vlgmr.msra.gmra.mrb[0].mxu0 %vm387_vm0, %v1760_v5 }
  0x22   : > { %1507 = vmatprep.mubr.msk.bf16.mxu0 %vm387_vm0, %v1762_v6  ;;  %1522 = vmatpush3.bf16.msra.mxu0 %v1646_v9 }
  0x23   : > { %1523 = vmatprep.subr.bf16.mxu0 %v1647_v22 }
  0x26   : > { %1524 = vmatpush3.bf16.msra.mxu0 %v1647_v22 }
  0x29   : > { %1508 = vmatmul.mubr.msk.bf16.gmra.mrb[4].mxu0 %vm387_vm0, %v1768_v7 }
  0xf4   : > { %v1505_v10 = vpop.f32.mrb[0].mxu0 }
  0xf5   : > { %v434_v11 = vpop.f32.mrb[1].mxu0 }
  0xf6   : > { %v1506_v12 = vpop.f32.mrb[2].mxu0 }
  0xf7   : > { %v466_v13 = vpack.c.bf16 %v1506_v12, %v1505_v10  ;;  %v437_v14 = vpop.f32.mrb[3].mxu0 }
  0xf8   : > { %v465_v15 = vpack.c.bf16 %v437_v14, %v434_v11 }
  0xfa   : > { %1513 = vmatprep.mubr.msk.bf16.mxu1 %vm484_vm1, %v465_v15 }
  0xfb   : > { %1514 = vmatmul.mubr.msk.bf16.vlgmr.msra.gmra.mrb[0].mxu1 %vm484_vm1, %v466_v13 }
  0xfc   : > { %v1509_v16 = vpop.f32.mrb[4].mxu0  ;;  %1550 = vmatpush3.bf16.msra.mxu1 %v1646_v9 }
  0xfd   : > { %v450_v17 = vpop.f32.mrb[5].mxu0  ;;  %1551 = vmatprep.subr.bf16.mxu1 %v1647_v22 }
  0xfe   : > { %v1510_v18 = vpop.f32.mrb[6].mxu0 }
  0xff   : > { %v468_v19 = vpack.c.bf16 %v1510_v18, %v1509_v16  ;;  %v453_v20 = vpop.f32.mrb[7].mxu0 }
 0x100   : > { %v467_v21 = vpack.c.bf16 %v453_v20, %v450_v17  ;;  %1552 = vmatpush3.bf16.msra.mxu1 %v1647_v22  ;;  %v1649_v22 = vld [vmem:[%s1957_s6 + $0x18] sm:$0xff]  }
 0x101   : > { %1577 = vmatprep.subr.bf16.mxu1 %v1648_v0 }
 0x102   : > { %1517 = vmatprep.mubr.msk.bf16.mxu1 %vm484_vm1, %v467_v21 }
 0x103   : > { %1518 = vmatmul.mubr.msk.bf16.gmra.mrb[4].mxu1 %vm484_vm1, %v468_v19 }
 0x1ce   : > { %v1515_v24 = vpop.f32.mrb[0].mxu1 }
 0x1cf   : > { %v540_v25 = vadd.f32 %v1515_v24, %v1387_v23  ;;  %v531_v26 = vpop.f32.mrb[1].mxu1 }
 0x1d0   : > { %v532_v27 = vadd.f32 %v1387_v23, %v531_v26  ;;  %v1516_v28 = vpop.f32.mrb[2].mxu1 }
 0x1d1   : > { %v543_v29 = vadd.f32 %v1516_v28, %v1387_v23  ;;  %v534_v30 = vpop.f32.mrb[3].mxu1  ;;  %v564_v32 = vmax.f32 %v540_v25, 0.0 }
 0x1d2   : > { %v535_v31 = vadd.f32 %v1387_v23, %v534_v30  ;;  %v562_v34 = vmax.f32 %v532_v27, 0.0  ;;  %v1650_v30 = vld [vmem:[%s1957_s6] sm:$0xff]  }
 0x1d3   : > { %v565_v33 = vmax.f32 %v543_v29, 0.0 }
 0x1d4   : > { %v563_v35 = vmax.f32 %v535_v31, 0.0 }
 0x1d5   : > { %v1784_v36 = vpack.c.bf16 %v565_v33, %v564_v32 }
 0x1d6   : > { %v1786_v37 = vpack.c.bf16 %v563_v35, %v562_v34  ;;  %v1519_v38 = vpop.f32.mrb[4].mxu1  ;;  %v1651_v35 = vld [vmem:[%s1957_s6 + $0x8] sm:$0xff]  }
 0x1d7   : > { %v556_v39 = vadd.f32 %v1519_v38, %v1387_v23  ;;  %v547_v40 = vpop.f32.mrb[5].mxu1  ;;  %v1652_v38 = vld [vmem:[%s1957_s6 + $0x20] sm:$0xff]  }
 0x1d8   : > { %v548_v41 = vadd.f32 %v1387_v23, %v547_v40  ;;  %v1520_v42 = vpop.f32.mrb[6].mxu1  ;;  %1525 = vmatprep.mubr.msk.bf16.mxu0 %vm590_vm2, %v1786_v37 }
 0x1d9   : > { %v559_v43 = vadd.f32 %v1520_v42, %v1387_v23  ;;  %v550_v44 = vpop.f32.mrb[7].mxu1  ;;  %1526 = vmatmul.mubr.msk.bf16.vlgmr.msra.gmra.mrb[8].mxu0 %vm590_vm2, %v1784_v36  ;;  %v568_v46 = vmax.f32 %v556_v39, 0.0 }
 0x1da   : > { %v551_v45 = vadd.f32 %v1387_v23, %v550_v44  ;;  %v566_v48 = vmax.f32 %v548_v41, 0.0 }
 0x1db   : > { %v569_v47 = vmax.f32 %v559_v43, 0.0 }
 0x1dc   : > { %v567_v49 = vmax.f32 %v551_v45, 0.0 }
 0x1dd   : > { %v1792_v50 = vpack.c.bf16 %v569_v47, %v568_v46 }
 0x1de   : > { %v1794_v51 = vpack.c.bf16 %v567_v49, %v566_v48  ;;  %v1653_v49 = vld [vmem:[%s1957_s6 + $0x28] sm:$0xff]  }
 0x1e0   : > { %1529 = vmatprep.mubr.msk.bf16.mxu0 %vm590_vm2, %v1794_v51 }
 0x1e1   : > { %1530 = vmatmul.mubr.msk.bf16.gmra.mrb[12].mxu0 %vm590_vm2, %v1792_v50 }
 0x1e2   : > { %1541 = vmatprep.mubr.msk.bf16.mxu0 %vm387_vm0, %v1756_v3 }
 0x2ac   : > { %v1527_v52 = vpop.f32.mrb[8].mxu0 }
 0x2ad   : > { %v637_v53 = vpop.f32.mrb[9].mxu0 }
 0x2ae   : > { %v1528_v54 = vpop.f32.mrb[10].mxu0 }
 0x2af   : > { %v669_v55 = vpack.c.bf16 %v1528_v54, %v1527_v52  ;;  %v640_v56 = vpop.f32.mrb[11].mxu0 }
 0x2b0   : > { %v668_v57 = vpack.c.bf16 %v640_v56, %v637_v53 }
 0x2b2   : > { %1533 = vmatprep.subr.bf16.mxu0 %v668_v57 }
 0x2b3   : > { %1534 = vmatpush3.bf16.msra.mxu0 %v668_v57 }
 0x2b4   : > { %v1531_v58 = vpop.f32.mrb[12].mxu0  ;;  %1535 = vmatprep.subr.bf16.mxu0 %v669_v55 }
 0x2b5   : > { %v653_v59 = vpop.f32.mrb[13].mxu0 }
 0x2b6   : > { %v1532_v60 = vpop.f32.mrb[14].mxu0 }
 0x2b7   : > { %v671_v61 = vpack.c.bf16 %v1532_v60, %v1531_v58  ;;  %v656_v62 = vpop.f32.mrb[15].mxu0  ;;  %1536 = vmatpush3.bf16.msra.mxu0 %v669_v55 }
 0x2b8   : > { %v670_v63 = vpack.c.bf16 %v656_v62, %v653_v59 }
 0x2ba   : > { %1537 = vmatprep.subr.bf16.mxu0 %v670_v63 }
 0x2bb   : > { %1538 = vmatpush3.bf16.msra.mxu0 %v670_v63 }
 0x2bc   : > { %1539 = vmatprep.subr.bf16.mxu0 %v671_v61 }
 0x2bf   : > { %1540 = vmatpush3.bf16.msra.mxu0 %v671_v61 }
 0x2c2   : > { %1542 = vmatmul.mubr.msk.bf16.vlgmr.msra.gmra.mrb[16].mxu0 %vm387_vm0, %v1760_v5 }
 0x2c3   : > { %1545 = vmatprep.mubr.msk.bf16.mxu0 %vm387_vm0, %v1762_v6 }
 0x2ca   : > { %1546 = vmatmul.mubr.msk.bf16.gmra.mrb[20].mxu0 %vm387_vm0, %v1768_v7 }
 0x2cb   : > { %1569 = vmatprep.mubr.msk.bf16.mxu0 %vm387_vm0, %v1756_v3 }
 0x395   : > { %v1543_v2 = vpop.f32.mrb[16].mxu0 }
 0x396   : > { %v722_v4 = vadd.f32 %v1543_v2, %v1816_v1  ;;  %v713_v8 = vpop.f32.mrb[17].mxu0 }
 0x397   : > { %v714_v9 = vadd.f32 %v1816_v1, %v713_v8  ;;  %v1544_v10 = vpop.f32.mrb[18].mxu0 }
 0x398   : > { %v725_v11 = vadd.f32 %v1544_v10, %v1816_v1  ;;  %v716_v3 = vpop.f32.mrb[19].mxu0  ;;  %v746_v13 = vmax.f32 %v722_v4, 0.0 }
 0x399   : > { %v717_v12 = vadd.f32 %v1816_v1, %v716_v3  ;;  %v744_v15 = vmax.f32 %v714_v9, 0.0 }
 0x39a   : > { %v747_v14 = vmax.f32 %v725_v11, 0.0 }
 0x39b   : > { %v745_v16 = vmax.f32 %v717_v12, 0.0 }
 0x39c   : > { %v753_v17 = vpack.c.bf16 %v747_v14, %v746_v13 }
 0x39d   : > { %v752_v18 = vpack.c.bf16 %v745_v16, %v744_v15  ;;  %v1547_v19 = vpop.f32.mrb[20].mxu0  ;;  %v1430_v15 = vld [vmem:[%s1958_s7] ss:$0 sm:$0xff] }
 0x39e   : > { %v738_v20 = vadd.f32 %v1547_v19, %v1816_v1  ;;  %v729_v21 = vpop.f32.mrb[21].mxu0 }
 0x39f   : > { %v730_v23 = vadd.f32 %v1816_v1, %v729_v21  ;;  %v1548_v24 = vpop.f32.mrb[22].mxu0  ;;  %1553 = vmatprep.mubr.msk.bf16.mxu1 %vm590_vm2, %v752_v18 }
 0x3a0   : > { %v741_v25 = vadd.f32 %v1548_v24, %v1816_v1  ;;  %v732_v26 = vpop.f32.mrb[23].mxu0  ;;  %1554 = vmatmul.mubr.msk.bf16.vlgmr.msra.gmra.mrb[8].mxu1 %vm590_vm2, %v753_v17  ;;  %v750_v28 = vmax.f32 %v738_v20, 0.0 }
 0x3a1   : > { %v733_v27 = vadd.f32 %v1816_v1, %v732_v26  ;;  %1578 = vmatpush3.bf16.msra.mxu1 %v1648_v0  ;;  %v748_v31 = vmax.f32 %v730_v23, 0.0 }
 0x3a2   : > { %v751_v29 = vmax.f32 %v741_v25, 0.0  ;;  %1579 = vmatprep.subr.bf16.mxu1 %v1649_v22 }
 0x3a3   : > { %v749_v32 = vmax.f32 %v733_v27, 0.0 }
 0x3a4   : > { %v755_v33 = vpack.c.bf16 %v751_v29, %v750_v28 }
 0x3a5   : > { %v754_v34 = vpack.c.bf16 %v749_v32, %v748_v31  ;;  %1580 = vmatpush3.bf16.msra.mxu1 %v1649_v22 }
 0x3a6   : > { %1589 = vmatprep.subr.bf16.mxu1 %v1650_v30 }
 0x3a7   : > { %1557 = vmatprep.mubr.msk.bf16.mxu1 %vm590_vm2, %v754_v34 }
 0x3a8   : > { %1558 = vmatmul.mubr.msk.bf16.gmra.mrb[12].mxu1 %vm590_vm2, %v755_v33 }
 0x3a9   : > { %1581 = vmatprep.mubr.msk.bf16.mxu1 %vm590_vm2, %v752_v18 }
 0x3b0   : > { %1582 = vmatmul.mubr.msk.bf16.vlgmr.msra.gmra.mrb[16].mxu1 %vm590_vm2, %v753_v17 }
 0x3b1   : > { %1585 = vmatprep.mubr.msk.bf16.mxu1 %vm590_vm2, %v754_v34  ;;  %1590 = vmatpush3.bf16.msra.mxu1 %v1650_v30 }
 0x3b2   : > { %1591 = vmatprep.subr.bf16.mxu1 %v1651_v35 }
 0x3b5   : > { %1592 = vmatpush3.bf16.msra.mxu1 %v1651_v35 }
 0x3b6   : > { %1601 = vmatprep.subr.bf16.mxu1 %v1652_v38 }
 0x3b8   : > { %1586 = vmatmul.mubr.msk.bf16.gmra.mrb[20].mxu1 %vm590_vm2, %v755_v33 }
 0x3b9   : > { %1593 = vmatprep.mubr.msk.bf16.mxu1 %vm590_vm2, %v1786_v37 }
 0x3c0   : > { %1594 = vmatmul.mubr.msk.bf16.vlgmr.msra.gmra.mrb[16].mxu1 %vm590_vm2, %v1784_v36 }
 0x3c1   : > { %1597 = vmatprep.mubr.msk.bf16.mxu1 %vm590_vm2, %v1794_v51  ;;  %1602 = vmatpush3.bf16.msra.mxu1 %v1652_v38 }
 0x3c2   : > { %1603 = vmatprep.subr.bf16.mxu1 %v1653_v49 }
 0x3c5   : > { %1604 = vmatpush3.bf16.msra.mxu1 %v1653_v49 }
 0x3c8   : > { %1598 = vmatmul.mubr.msk.bf16.gmra.mrb[20].mxu1 %vm590_vm2, %v1792_v50 }
 0x473   : > { %v1555_v39 = vpop.f32.mrb[8].mxu1 }
 0x474   : > { %v802_v40 = vpop.f32.mrb[9].mxu1 }
 0x475   : > { %v1556_v41 = vpop.f32.mrb[10].mxu1 }
 0x476   : > { %v834_v42 = vpack.c.bf16 %v1556_v41, %v1555_v39  ;;  %v805_v37 = vpop.f32.mrb[11].mxu1 }
 0x477   : > { %v833_v43 = vpack.c.bf16 %v805_v37, %v802_v40 }
 0x479   : > { %1561 = vmatprep.subr.bf16.mxu0 %v833_v43 }
 0x47a   : > { %1562 = vmatpush3.bf16.msra.mxu0 %v833_v43 }
 0x47b   : > { %v1559_v36 = vpop.f32.mrb[12].mxu1  ;;  %1563 = vmatprep.subr.bf16.mxu0 %v834_v42 }
 0x47c   : > { %v818_v44 = vpop.f32.mrb[13].mxu1 }
 0x47d   : > { %v1560_v45 = vpop.f32.mrb[14].mxu1 }
 0x47e   : > { %v836_v46 = vpack.c.bf16 %v1560_v45, %v1559_v36  ;;  %v821_v47 = vpop.f32.mrb[15].mxu1  ;;  %1564 = vmatpush3.bf16.msra.mxu0 %v834_v42 }
 0x47f   : > { %v835_v48 = vpack.c.bf16 %v821_v47, %v818_v44 }
 0x481   : > { %1565 = vmatprep.subr.bf16.mxu0 %v835_v48 }
 0x482   : > { %1566 = vmatpush3.bf16.msra.mxu0 %v835_v48 }
 0x483   : > { %1567 = vmatprep.subr.bf16.mxu0 %v836_v46 }
 0x486   : > { %1568 = vmatpush3.bf16.msra.mxu0 %v836_v46 }
 0x489   : > { %1570 = vmatmul.mubr.msk.bf16.vlgmr.msra.gmra.mrb[24].mxu0 %vm387_vm0, %v1760_v5 }
 0x48a   : > { %1573 = vmatprep.mubr.msk.bf16.mxu0 %vm387_vm0, %v1762_v6 }
 0x491   : > { %1574 = vmatmul.mubr.msk.bf16.gmra.mrb[28].mxu0 %vm387_vm0, %v1768_v7 }
 0x55c   : > { %v1571_v50 = vpop.f32.mrb[24].mxu0 }
 0x55d   : > { %v880_v51 = vadd.f32 %v1571_v50, %v1816_v1  ;;  %v871_v52 = vpop.f32.mrb[25].mxu0 }
 0x55e   : > { %v872_v53 = vadd.f32 %v1816_v1, %v871_v52  ;;  %v1572_v54 = vpop.f32.mrb[26].mxu0 }
 0x55f   : > { %v883_v5 = vadd.f32 %v1572_v54, %v1816_v1  ;;  %v874_v55 = vpop.f32.mrb[27].mxu0  ;;  %v904_v56 = vmax.f32 %v880_v51, 0.0 }
 0x560   : > { %v875_v6 = vadd.f32 %v1816_v1, %v874_v55  ;;  %v902_v57 = vmax.f32 %v872_v53, 0.0 }
 0x561   : > { %v905_v7 = vmax.f32 %v883_v5, 0.0 }
 0x562   : > { %v903_v58 = vmax.f32 %v875_v6, 0.0 }
 0x563   : > { %v911_v59 = vpack.c.bf16 %v905_v7, %v904_v56 }
 0x564   : > { %v910_v60 = vpack.c.bf16 %v903_v58, %v902_v57  ;;  %v1575_v61 = vpop.f32.mrb[28].mxu0 }
 0x565   : > { %v896_v62 = vadd.f32 %v1575_v61, %v1816_v1  ;;  %v887_v63 = vpop.f32.mrb[29].mxu0 }
 0x566   : > { %v888_v0 = vadd.f32 %v1816_v1, %v887_v63  ;;  %v1576_v2 = vpop.f32.mrb[30].mxu0  ;;  %1605 = vmatprep.mubr.msk.bf16.mxu1 %vm590_vm2, %v910_v60 }
 0x567   : > { %v908_v4 = vmax.f32 %v896_v62, 0.0  ;;  %v899_v8 = vadd.f32 %v1576_v2, %v1816_v1  ;;  %v890_v9 = vpop.f32.mrb[31].mxu0  ;;  %1606 = vmatmul.mubr.msk.bf16.vlgmr.msra.gmra.mrb[16].mxu1 %vm590_vm2, %v911_v59 }
 0x568   : > { %v891_v10 = vadd.f32 %v1816_v1, %v890_v9  ;;  %v906_v3 = vmax.f32 %v888_v0, 0.0 }
 0x569   : > { %v909_v11 = vmax.f32 %v899_v8, 0.0 }
 0x56a   : > { %v907_v12 = vmax.f32 %v891_v10, 0.0 }
 0x56b   : > { %v913_v13 = vpack.c.bf16 %v909_v11, %v908_v4 }
 0x56c   : > { %v912_v14 = vpack.c.bf16 %v907_v12, %v906_v3 }
 0x56e   : > { %1609 = vmatprep.mubr.msk.bf16.mxu1 %vm590_vm2, %v912_v14 }
 0x56f   : > { %1610 = vmatmul.mubr.msk.bf16.gmra.mrb[20].mxu1 %vm590_vm2, %v913_v13 }
 0x63a   : > { %v1607_v16 = vpop.f32.mrb[16].mxu1 }
 0x63b   : > { %v1186_v17 = vadd.f32 %v1607_v16, %v1430_v15  ;;  %v1138_v18 = vpop.f32.mrb[17].mxu1 }
 0x63c   : > { %v1184_v19 = vadd.f32 %v1430_v15, %v1138_v18  ;;  %v1608_v20 = vpop.f32.mrb[18].mxu1 }
 0x63d   : > { %v1187_v1 = vadd.f32 %v1608_v20, %v1430_v15  ;;  %v1141_v21 = vpop.f32.mrb[19].mxu1  ;;  %v1199_v22 = vsel %vm1192_vm3, %v1186_v17, -inf }
 0x63e   : > { %v1185_v23 = vadd.f32 %v1430_v15, %v1141_v21  ;;  %1200 = vmax.xlane.f32.xlu1 %v1199_v22  ;;  %v1193_v24 = vsel %vm1192_vm3, %v1184_v19, -inf }
 0x63f   : > { %1194 = vmax.xlane.f32.xlu0 %v1193_v24  ;;  %v1202_v25 = vsel %vm1192_vm3, %v1187_v1, -inf }
 0x640   : > { %v1196_v27 = vsel %vm1192_vm3, %v1185_v23, -inf }
 0x642   : > { %1203 = vmax.xlane.f32.xlu1 %v1202_v25  ;;  %v1611_v26 = vpop.f32.mrb[20].mxu1 }
 0x643   : > { %1197 = vmax.xlane.f32.xlu0 %v1196_v27  ;;  %v1154_v28 = vpop.f32.mrb[21].mxu1  ;;  %v1190_v32 = vadd.f32 %v1611_v26, %v1430_v15 }
 0x644   : > { %v1188_v29 = vadd.f32 %v1430_v15, %v1154_v28  ;;  %v1612_v30 = vpop.f32.mrb[22].mxu1 }
 0x645   : > { %v1157_v31 = vpop.f32.mrb[23].mxu1  ;;  %v1191_v35 = vadd.f32 %v1612_v30, %v1430_v15  ;;  %v1211_v39 = vsel %vm1192_vm3, %v1190_v32, -inf }
 0x646   : > { %v1189_v33 = vadd.f32 %v1430_v15, %v1157_v31  ;;  %v1205_v34 = vsel %vm1192_vm3, %v1188_v29, -inf }
 0x647   : > { %1206 = vmax.xlane.f32.xlu0 %v1205_v34  ;;  %v1214_v40 = vsel %vm1192_vm3, %v1191_v35, -inf }
 0x648   : > { %v1208_v38 = vsel %vm1192_vm3, %v1189_v33, -inf }
 0x649   : > { %1209 = vmax.xlane.f32.xlu1 %v1208_v38 }
 0x64b   : > { %1212 = vmax.xlane.f32.xlu0 %v1211_v39 }
 0x64d   : > { %1215 = vmax.xlane.f32.xlu1 %v1214_v40 }
 0x6cb   : > { %v1201_v41 = vpop.xlane.xlu1 %1200 }
 0x6cc   : > { %v1886_v42 = vsub.f32 %v1186_v17, %v1201_v41  ;;  %v1195_v37 = vpop.xlane.xlu0 %1194 }
 0x6cd   : > { %v1888_v43 = vsub.f32 %v1184_v19, %v1195_v37 }
 0x6ce   : > { %v1229_v36 = vmul.f32 1.442695, %v1886_v42 }
 0x6cf   : > { %v1225_v44 = vmul.f32 1.442695, %v1888_v43  ;;  %v1204_v45 = vpop.xlane.xlu1 %1203 }
 0x6d0   : > { %1654 = vpow2.f32 %v1229_v36  ;;  %v1892_v46 = vsub.f32 %v1187_v1, %v1204_v45  ;;  %v1198_v47 = vpop.xlane.xlu0 %1197 }
 0x6d1   : > { %v1894_v48 = vsub.f32 %v1185_v23, %v1198_v47  ;;  %1656 = vpow2.f32 %v1225_v44 }
 0x6d2   : > { %v1231_v49 = vmul.f32 1.442695, %v1892_v46 }
 0x6d3   : > { %v1227_v50 = vmul.f32 1.442695, %v1894_v48 }
 0x6d4   : > { %1658 = vpow2.f32 %v1231_v49  ;;  %v1207_v51 = vpop.xlane.xlu0 %1206 }
 0x6d5   : > { %v1898_v52 = vsub.f32 %v1188_v29, %v1207_v51  ;;  %1660 = vpow2.f32 %v1227_v50 }
 0x6d6   : > { %v1210_v53 = vpop.xlane.xlu1 %1209 }
 0x6d7   : > { %v1233_v54 = vmul.f32 1.442695, %v1898_v52  ;;  %v1901_v5 = vsub.f32 %v1189_v33, %v1210_v53 }
 0x6d8   : > { %v1213_v55 = vpop.xlane.xlu0 %1212 }
 0x6d9   : > { %1662 = vpow2.f32 %v1233_v54  ;;  %v1235_v6 = vmul.f32 1.442695, %v1901_v5  ;;  %v1904_v56 = vsub.f32 %v1190_v32, %v1213_v55 }
 0x6da   : > { %v1655_v7 = vpop.eup %1654  ;;  %v1216_v57 = vpop.xlane.xlu1 %1215 }
 0x6db   : > { %1664 = vpow2.f32 %v1235_v6  ;;  %v1237_v58 = vmul.f32 1.442695, %v1904_v56  ;;  %v1907_v59 = vsub.f32 %v1191_v35, %v1216_v57  ;;  %v1247_v60 = vsel %vm1192_vm3, %v1655_v7, 0.0  ;;  %v1657_v61 = vpop.eup %1656 }
 0x6dc   : > { %1248 = vadd.xlane.f32.xlu0 %v1247_v60  ;;  %v1241_v0 = vsel %vm1192_vm3, %v1657_v61, 0.0 }
 0x6dd   : > { %1666 = vpow2.f32 %v1237_v58  ;;  %v1239_v62 = vmul.f32 1.442695, %v1907_v59 }
 0x6de   : > { %v1659_v63 = vpop.eup %1658 }
 0x6df   : > { %1668 = vpow2.f32 %v1239_v62  ;;  %v1250_v2 = vsel %vm1192_vm3, %v1659_v63, 0.0  ;;  %v1661_v4 = vpop.eup %1660 }
 0x6e0   : > { %1242 = vadd.xlane.f32.xlu0 %v1241_v0  ;;  %1251 = vadd.xlane.f32.xlu1 %v1250_v2  ;;  %v1244_v9 = vsel %vm1192_vm3, %v1661_v4, 0.0 }
 0x6e3   : > { %v1663_v8 = vpop.eup %1662 }
 0x6e4   : > { %1245 = vadd.xlane.f32.xlu1 %v1244_v9  ;;  %v1253_v10 = vsel %vm1192_vm3, %v1663_v8, 0.0 }
 0x6e5   : > { %v1665_v11 = vpop.eup %1664  ;;  %1254 = vadd.xlane.f32.xlu0 %v1253_v10 }
 0x6e6   : > { %v1256_v3 = vsel %vm1192_vm3, %v1665_v11, 0.0 }
 0x6e7   : > { %v1667_v12 = vpop.eup %1666 }
 0x6e8   : > { %1257 = vadd.xlane.f32.xlu1 %v1256_v3  ;;  %v1259_v13 = vsel %vm1192_vm3, %v1667_v12, 0.0 }
 0x6e9   : > { %v1669_v14 = vpop.eup %1668  ;;  %1260 = vadd.xlane.f32.xlu0 %v1259_v13 }
 0x6ea   : > { %v1262_v15 = vsel %vm1192_vm3, %v1669_v14, 0.0 }
 0x6ec   : > { %1263 = vadd.xlane.f32.xlu1 %v1262_v15 }
 0x769   : > { %v1249_v16 = vpop.xlane.xlu0 %1248 }
 0x76a   : > { %1670 = vlog2.f32 %v1249_v16 }
 0x76d   : > { %v1243_v17 = vpop.xlane.xlu0 %1242  ;;  %v1252_v18 = vpop.xlane.xlu1 %1251 }
 0x76e   : > { %1672 = vlog2.f32 %v1243_v17 }
 0x76f   : > { %1674 = vlog2.f32 %v1252_v18 }
 0x771   : > { %v1246_v19 = vpop.xlane.xlu1 %1245 }
 0x772   : > { %1676 = vlog2.f32 %v1246_v19  ;;  %v1255_v20 = vpop.xlane.xlu0 %1254 }
 0x773   : > { %1678 = vlog2.f32 %v1255_v20 }
 0x774   : > { %v1671_v1 = vpop.eup %1670 }
 0x775   : > { %v1270_v21 = vmul.f32 0.6931472, %v1671_v1  ;;  %v1258_v22 = vpop.xlane.xlu1 %1257 }
 0x776   : > { %1680 = vlog2.f32 %v1258_v22  ;;  %v1261_v23 = vpop.xlane.xlu0 %1260 }
 0x777   : > { %v1283_v24 = vsub.f32 %v1886_v42, %v1270_v21  ;;  %1682 = vlog2.f32 %v1261_v23 }
 0x778   : > { %v1673_v25 = vpop.eup %1672 }
 0x779   : > { %v1675_v26 = vpop.eup %1674  ;;  %1291 = vst.msk [vmem:[%s1922_s21 + $0x10] sm:$0xff] %vm1192_vm3, %v1283_v24  ;;  %v1266_v27 = vmul.f32 0.6931472, %v1673_v25  ;;  %v1264_v28 = vpop.xlane.xlu1 %1263 }
 0x77a   : > { %v1272_v29 = vmul.f32 0.6931472, %v1675_v26  ;;  %1684 = vlog2.f32 %v1264_v28 }
 0x77b   : > { %v1281_v30 = vsub.f32 %v1888_v43, %v1266_v27 }
 0x77c   : > { %v1677_v31 = vpop.eup %1676  ;;  %v1284_v32 = vsub.f32 %v1892_v46, %v1272_v29 }
 0x77d   : > { %v1679_v33 = vpop.eup %1678  ;;  %1289 = vst.msk [vmem:[%s1922_s21] sm:$0xff] %vm1192_vm3, %v1281_v30  ;;  %v1268_v34 = vmul.f32 0.6931472, %v1677_v31 }
 0x77e   : > { %1292 = vst.msk [vmem:[%s1922_s21 + $0x18] sm:$0xff] %vm1192_vm3, %v1284_v32  ;;  %v1274_v35 = vmul.f32 0.6931472, %v1679_v33 }
 0x77f   : > { %v1282_v38 = vsub.f32 %v1894_v48, %v1268_v34 }
 0x780   : > { %v1681_v39 = vpop.eup %1680  ;;  %v1285_v40 = vsub.f32 %v1898_v52, %v1274_v35 }
 0x781   : > { %v1683_v41 = vpop.eup %1682  ;;  %1290 = vst.msk [vmem:[%s1922_s21 + $0x8] sm:$0xff] %vm1192_vm3, %v1282_v38  ;;  %v1276_v42 = vmul.f32 0.6931472, %v1681_v39 }
 0x782   : > { %1293 = vst.msk [vmem:[%s1922_s21 + $0x20] sm:$0xff] %vm1192_vm3, %v1285_v40  ;;  %v1278_v37 = vmul.f32 0.6931472, %v1683_v41 }
 0x783   : > { %v1286_v43 = vsub.f32 %v1901_v5, %v1276_v42 }
 0x784   : > { %v1685_v36 = vpop.eup %1684  ;;  %v1287_v44 = vsub.f32 %v1904_v56, %v1278_v37 }
 0x785   : > { %1294 = vst.msk [vmem:[%s1922_s21 + $0x28] sm:$0xff] %vm1192_vm3, %v1286_v43  ;;  %v1280_v45 = vmul.f32 0.6931472, %v1685_v36 }
 0x786   : > { %1295 = vst.msk [vmem:[%s1922_s21 + $0x30] sm:$0xff] %vm1192_vm3, %v1287_v44 }
 0x787   : > { %v1288_v46 = vsub.f32 %v1907_v59, %v1280_v45 }
 0x789   : > { %1296 = vst.msk [vmem:[%s1922_s21 + $0x38] sm:$0xff] %vm1192_vm3, %v1288_v46 }
 0x78a PF: > { %s18_s27 = sadd.s32 1, %s1692_s27  }
 0x78b   : > { %p15_p4 = scmp.ge.s32.totalorder %s18_s27, 10  }
 0x78d   :  { %17 = sbr.rel (!%p15_p4) target bundleno = 1 (0x1), region = 85 }

</bundles_post_ra>
